<compile_context>
chip_gen: v6e
topology: v6e:2x2x1
jax: 0.10.0
libtpu: 0.0.40
codegen_flags: <defaults>
</compile_context>

<pallas_src>
import jax
import jax.numpy as jnp
from jax.experimental import pallas as pl
from jax.experimental.pallas import tpu as pltpu

IN_FEATURES = 64
OUT_FEATURES = 32
_ROW_TILE = 128  # rows per grid step in the batched path (multiple of 8)


def _linear_relu_kernel(x_ref, w_ref, b_ref, o_ref):
    # x_ref: (tm, IN), w_ref: (IN, OUT), b_ref: (1, OUT), o_ref: (tm, OUT)
    acc = jnp.dot(x_ref[...], w_ref[...], preferred_element_type=jnp.float32)
    acc = acc + b_ref[...]                      # broadcast bias over rows
    o_ref[...] = jnp.maximum(acc, 0.0).astype(o_ref.dtype)


def prepare_params(w, b):
    """One-time parameter prep (hoisted out of the per-call path).

    w: (OUT, IN) float32 in PyTorch nn.Linear layout; b: (OUT,) float32.
    Returns (w_t, b2) with w_t: (IN, OUT) for a lane-dense x @ W_t matmul and
    b2: (1, OUT) ready to broadcast inside the kernel.
    """
    return jnp.asarray(w).T, jnp.asarray(b).reshape(1, -1)


def linear_relu(x, w_t, b2):
    """x: (B, IN) f32; w_t: (IN, OUT) f32 (pre-transposed); b2: (1, OUT) f32."""
    B, IN = x.shape
    OUT = w_t.shape[1]
    out_shape = jax.ShapeDtypeStruct((B, OUT), x.dtype)

    if B <= _ROW_TILE or B % _ROW_TILE != 0:
        # Small / irregular batch (incl. the spec's B=1): single gridless
        # invocation, all operands resident in VMEM, no pipeline machinery.
        return pl.pallas_call(
            _linear_relu_kernel,
            out_shape=out_shape,
            in_specs=[
                pl.BlockSpec(memory_space=pltpu.MemorySpace.VMEM),
                pl.BlockSpec(memory_space=pltpu.MemorySpace.VMEM),
                pl.BlockSpec(memory_space=pltpu.MemorySpace.VMEM),
            ],
            out_specs=pl.BlockSpec(memory_space=pltpu.MemorySpace.VMEM),
        )(x, w_t, b2)

    # Batched path: grid over row tiles. Weight/bias index_maps return a
    # constant block, so they are DMA'd once and stay VMEM-resident across the
    # whole grid; "parallel" lets v7x shard row tiles across its 2 TensorCores.
    # TODO(synk): if OUT stays at 32, pad the output lane dim to 128 (zero
    # weight columns + slice outside) for fully lane-dense stores at scale.
    grid = (B // _ROW_TILE,)
    return pl.pallas_call(
        _linear_relu_kernel,
        out_shape=out_shape,
        grid=grid,
        in_specs=[
            pl.BlockSpec((_ROW_TILE, IN), lambda i: (i, 0)),
            pl.BlockSpec((IN, OUT), lambda i: (0, 0)),   # resident
            pl.BlockSpec((1, OUT), lambda i: (0, 0)),    # resident
        ],
        out_specs=pl.BlockSpec((_ROW_TILE, OUT), lambda i: (i, 0)),
        compiler_params=pltpu.CompilerParams(
            dimension_semantics=("parallel",)
        ),
    )(x, w_t, b2)


if __name__ == "__main__":
    IN, OUT = IN_FEATURES, OUT_FEATURES
    key = jax.random.PRNGKey(0)
    kx, kw, kb, kxb = jax.random.split(key, 4)

    # Deterministic parameter init mimicking nn.Linear (uniform +/- 1/sqrt(IN))
    bound = 1.0 / (IN ** 0.5)
    w = jax.random.uniform(kw, (OUT, IN), jnp.float32, -bound, bound)  # torch layout
    b = jax.random.uniform(kb, (OUT,), jnp.float32, -bound, bound)

    # One-time prep: transpose + bias reshape hoisted out of the call path.
    w_t, b2 = prepare_params(w, b)

    # Spec shape: x1 = torch.randn(1, 64)
    x1 = jax.random.normal(kx, (1, IN), jnp.float32)
    out1 = jax.block_until_ready(linear_relu(x1, w_t, b2))
    ref1 = jnp.maximum(x1 @ w.T + b, 0.0)
    assert out1.shape == (1, OUT)
    assert jnp.allclose(out1, ref1, atol=1e-5, rtol=1e-5)

    # Batched path: amortizes pallas_call fixed overhead, weight VMEM-resident.
    xb = jax.random.normal(kxb, (256, IN), jnp.float32)
    outb = jax.block_until_ready(linear_relu(xb, w_t, b2))
    refb = jnp.maximum(xb @ w.T + b, 0.0)
    assert outb.shape == (256, OUT)
    assert jnp.allclose(outb, refb, atol=1e-5, rtol=1e-5)

    print("KERNEL_OK")
</pallas_src>

<mosaic_0001>
module attributes {stable_mosaic.version = 11 : i64} {
  func.func @_linear_relu_kernel(%arg0: memref<1x64xf32, #tpu.memory_space<vmem>>, %arg1: memref<64x32xf32, #tpu.memory_space<vmem>>, %arg2: memref<1x32xf32, #tpu.memory_space<vmem>>, %arg3: memref<1x32xf32, #tpu.memory_space<vmem>>) attributes {dimension_semantics = [], scalar_prefetch = 0 : i64, scratch_operands = 0 : i64, tpu.core_type = #tpu.core_type<tc>} {
    %c0 = arith.constant 0 : index
    %c0_0 = arith.constant 0 : index
    %0 = vector.load %arg0[%c0, %c0_0] : memref<1x64xf32, #tpu.memory_space<vmem>>, vector<1x64xf32>
    %c0_1 = arith.constant 0 : index
    %c0_2 = arith.constant 0 : index
    %1 = vector.load %arg1[%c0_1, %c0_2] : memref<64x32xf32, #tpu.memory_space<vmem>>, vector<64x32xf32>
    %cst = arith.constant dense<0.000000e+00> : vector<1x32xf32>
    %2 = tpu.matmul %0, %1, %cst {dimension_numbers = #tpu.dot_dimension_numbers<[1], [0], [0], [1], [0, 0, 1, 1], [], []>} : vector<1x64xf32>, vector<64x32xf32>, vector<1x32xf32> -> vector<1x32xf32>
    %c0_3 = arith.constant 0 : index
    %c0_4 = arith.constant 0 : index
    %3 = vector.load %arg2[%c0_3, %c0_4] : memref<1x32xf32, #tpu.memory_space<vmem>>, vector<1x32xf32>
    %4 = arith.addf %2, %3 : vector<1x32xf32>
    %cst_5 = arith.constant 0.000000e+00 : f32
    %5 = vector.broadcast %cst_5 : f32 to vector<1x32xf32>
    %6 = arith.maximumf %4, %5 : vector<1x32xf32>
    %c0_6 = arith.constant 0 : index
    %c0_7 = arith.constant 0 : index
    %7 = vector.load %arg3[%c0_6, %c0_7] : memref<1x32xf32, #tpu.memory_space<vmem>>, vector<1x32xf32>
    tpu.vector_store %arg3[%c0_6, %c0_7], %6 {strides = array<i32>} : memref<1x32xf32, #tpu.memory_space<vmem>>, vector<1x32xf32>,
    return
  }
}

</mosaic_0001>

<bundles_post_ra>
// kernel: tpu_custom_call.1
= control target key start
LH: loop header
LB: loop body
LE: loop exit
PB: predicated region body
PF: predicated region fallthrough
CT: control target
= control target key end

     0   :  { %v170_v1 = vmov 0.0   ;;  %vm171_vm0 = vmmov 0   ;;  %s226_s0 = inlined_call_operand.vmem [shape: f32[1,64], index: 0, kind: input, shape index: {}]   ;;  %s227_s1 = inlined_call_operand.vmem [shape: f32[64,32], index: 1, kind: input, shape index: {}]   ;;  %s228_s2 = inlined_call_operand.vmem [shape: f32[1,32], index: 2, kind: input, shape index: {}]   ;;  %s229_s3 = inlined_call_operand.hbm [shape: f32[1,32], index: 3, kind: output, shape index: {}]  }
   0x1   :  { %v23_v0 = vld [vmem:[%s227_s1 + $0x38] sm:$0xff]  ;;  %126 = vmatprep.subr.mxu0 %v170_v1  ;;  %v22_v2 = vld [vmem:[%s227_s1 + $0x30] sm:$0xff]  ;;  %142 = vmatprep.mubr.msk.f32.mxu0 %vm171_vm0, %v170_v1  ;;  %v21_v3 = vld [vmem:[%s227_s1 + $0x28] sm:$0xff] }
   0x2   :  { %127 = vmatpush3.msra.mxu0 %v23_v0 }
   0x3   :  { %128 = vmatprep.subr.mxu0 %v170_v1 }
   0x4   :  { %8 = vsyncpa [#allocation3], 0  ;;  %129 = vmatpush3.msra.mxu0 %v22_v2  ;;  %v20_v4 = vld [vmem:[%s227_s1 + $0x20] sm:$0xff]  ;;  %v19_v5 = vld [vmem:[%s227_s1 + $0x18] sm:$0xff]  ;;  %vm25_vm1 = vcmask 523264   ;;  %s172_s5 = smov [#allocation2]  }
   0x5   :  { %130 = vmatprep.subr.mxu0 %v170_v1  ;;  %v18_v6 = vld [vmem:[%s227_s1 + $0x10] sm:$0xff]  ;;  %v17_v7 = vld [vmem:[%s227_s1 + $0x8] sm:$0xff]  ;;  %v16_v8 = vld [vmem:[%s227_s1] sm:$0xff]  ;;  %s108_s6 = sshll.u32 %s172_s5, 4  ;;  %vm100_vm2 = vcmask 253952   ;;  %s109_s6 = int_to_ptr.vmem [resolvable:$true] %s108_s6 }
   0x6   :  { %131 = vmatpush3.msra.mxu0 %v21_v3  ;;  %v15_v9 = vld [vmem:[%s226_s0] sm:$0x1]  ;;  %s148_s1 = scalar_lea.vmem %s109_s6, 16  ;;  %s152_s0 = scalar_lea.vmem %s109_s6, 32 }
   0x7   :  { %132 = vmatprep.subr.mxu0 %v170_v1  ;;  %v24_v10 = vld [vmem:[%s228_s2] sm:$0x1]  ;;  %p149_p0 = scmp.ne.s32.totalorder %s109_s6, %s148_s1  ;;  %p153_p1 = scmp.lt.s32.totalorder %s109_s6, %s109_s6 }
   0x8   :  { %133 = vmatpush3.msra.mxu0 %v20_v4  ;;  %p154_p2 = scmp.lt.s32.totalorder %s152_s0, %s148_s1 }
   0x9   :  { %134 = vmatprep.subr.mxu0 %v170_v1 }
   0xa   :  { %135 = vmatpush3.msra.mxu0 %v19_v5  ;;  %p155_p3 = por %p154_p2, %p153_p1 }
   0xb   :  { %136 = vmatprep.subr.mxu0 %v170_v1 }
   0xc   :  { %137 = vmatpush3.msra.mxu0 %v18_v6  ;;  %p156_p4 = pnand %p155_p3, %p149_p0 }
   0xd   :  { %138 = vmatprep.subr.mxu0 %v170_v1 }
   0xe   :  { %139 = vmatpush3.msra.mxu0 %v17_v7 }
   0xf   :  { %140 = vmatprep.subr.mxu0 %v170_v1 }
  0x10   :  { %141 = vmatpush3.msra.mxu0 %v16_v8 }
  0x11   :  { %143 = vmatmul.mubr.msk.f32.vlgmr.msra.gmra.mxu0 %vm25_vm1, %v15_v9 }
  0xd1   :  { %v95_v11 = vpop.f32.mrf.mxu0 }
  0xd2   :  { %v96_v12 = vadd.f32 %v95_v11, %v24_v10 }
  0xd3   :  { %v144_v13 = vpop.f32.mrf.mxu0 }
  0xd4   :  { %v99_v14 = vmax.f32 %v96_v12, 0.0 }
  0xd6   :  { %101 = vst.msk [vmem:[#allocation2] sm:$0x1] %vm100_vm2, %v99_v14 }
  0xd7   :  { %159 = shalt.err (!%p156_p4)
}
  0xd8   :  { %111 = dma.vmem_to_hbm [thread:$0]  %s109_s6, 16, %s229_s3, [#allocation3]  }
  0xd9   :  { %168 = dma.done.wait [#allocation3], 16  }
  0xda   :  { %169 = vsyncadd [#allocation3], 4294967280 }
  0xdb   :  { %115 = vsyncpa [#allocation3], 1 }

</bundles_post_ra>
